<compile_context>
chip_gen: v7x
topology: tpu7x:2x2x1
jax: 0.10.0
libtpu: 0.0.40
codegen_flags: <defaults>
</compile_context>

<pallas_src>
import jax
import jax.numpy as jnp
from jax.experimental import pallas as pl
from jax.experimental.pallas import tpu as pltpu


def _round_up(x, m):
    return (x + m - 1) // m * m


# Tile preferences: comfortably within the scoped-VMEM budget on v5e/v6e/v7x
# (per-step live buffers with double-buffering stay well under ~8 MiB).
_TM_PREF, _TN_PREF, _TK_PREF = 512, 256, 512
_VMEM_LIMIT = 32 * 1024 * 1024


def _tile(dim, pref, align):
    """Tile size (<= pref, multiple of align) and padded dim (multiple of tile)."""
    t = min(pref, _round_up(dim, align))
    return t, _round_up(dim, t)


# -------------------- Mish: one transcendental --------------------------------

def _mish(y):
    # y * tanh(softplus(y)) with a single exp:
    #   tanh(log1p(e^y)) == t / (t + 2)   where t = e^y * (e^y + 2)
    # PyTorch softplus threshold=20 passthrough kept via the jnp.where.
    e = jnp.exp(jnp.minimum(y, 20.0))
    t = e * (e + 2.0)
    m = y * t * pl.reciprocal(t + 2.0, approx=True)
    return jnp.where(y > 20.0, y, m)


# -------------------- fused tiled matmul + BN + Mish kernel -------------------

def _make_kernel(n_inputs, has_residual):
    def kernel(*refs):
        p_refs = refs[:n_inputs]
        w_refs = refs[n_inputs:2 * n_inputs]
        s_ref = refs[2 * n_inputs]
        b_ref = refs[2 * n_inputs + 1]
        if has_residual:
            r_ref = refs[2 * n_inputs + 2]
            o_ref = refs[2 * n_inputs + 3]
        else:
            r_ref = None
            o_ref = refs[2 * n_inputs + 2]
        acc_ref = refs[-1]

        @pl.when(pl.program_id(2) == 0)
        def _():
            acc_ref[...] = jnp.zeros_like(acc_ref)

        partial = jnp.zeros(acc_ref.shape, jnp.float32)
        for p_ref, w_ref in zip(p_refs, w_refs):
            partial += jnp.dot(p_ref[...], w_ref[...],
                               preferred_element_type=jnp.float32)
        acc_ref[...] += partial

        @pl.when(pl.program_id(2) == pl.num_programs(2) - 1)
        def _():
            y = acc_ref[...] * s_ref[...] + b_ref[...]
            m = _mish(y)
            o_ref[...] = (r_ref[...] + m) if has_residual else m

    return kernel


def _fused_matmul(ps, ws, scale, bias, residual=None):
    """out = mish((sum_i p_i @ w_i) * scale + bias) [+ residual]

    p_i: (M, K) f32, w_i: (K, cout) f32 (all K equal), residual: (M, cout) f32.
    Returns (M, cout) f32.  MXU inputs are cast to bf16; accumulation/epilogue f32.
    """
    M, K = ps[0].shape
    cout = ws[0].shape[1]
    assert all(p.shape == (M, K) for p in ps)
    assert all(w.shape == (K, cout) for w in ws)

    tm, Mp = _tile(M, _TM_PREF, 16)      # bf16 sublane packing -> multiple of 16
    tn, Cp = _tile(cout, _TN_PREF, 128)  # lane-dense output tile
    tk, Kp = _tile(K, _TK_PREF, 128)

    def pad2(a, rows, cols, dtype):
        a = a.astype(dtype)
        return jnp.pad(a, ((0, rows - a.shape[0]), (0, cols - a.shape[1])))

    p_pads = [pad2(p, Mp, Kp, jnp.bfloat16) for p in ps]
    w_pads = [pad2(w, Kp, Cp, jnp.bfloat16) for w in ws]
    s_pad = pad2(scale.reshape(1, -1), 1, Cp, jnp.float32)
    b_pad = pad2(bias.reshape(1, -1), 1, Cp, jnp.float32)

    args = p_pads + w_pads + [s_pad, b_pad]
    in_specs = (
        [pl.BlockSpec((tm, tk), lambda i, j, k: (i, k)) for _ in ps]
        + [pl.BlockSpec((tk, tn), lambda i, j, k: (k, j)) for _ in ws]
        + [pl.BlockSpec((1, tn), lambda i, j, k: (0, j)),
           pl.BlockSpec((1, tn), lambda i, j, k: (0, j))]
    )
    if residual is not None:
        args.append(pad2(residual, Mp, Cp, jnp.float32))
        in_specs.append(pl.BlockSpec((tm, tn), lambda i, j, k: (i, j)))

    n_in = len(ps)
    kern = _make_kernel(n_in, residual is not None)

    bytes_accessed = int(sum(int(a.size) * a.dtype.itemsize for a in args)
                         + Mp * Cp * 4)
    cost = pl.CostEstimate(flops=int(2 * Mp * Kp * Cp * n_in),
                           transcendentals=int(Mp * Cp),
                           bytes_accessed=bytes_accessed)

    out = pl.pallas_call(
        kern,
        out_shape=jax.ShapeDtypeStruct((Mp, Cp), jnp.float32),
        grid=(Mp // tm, Cp // tn, Kp // tk),
        in_specs=in_specs,
        out_specs=pl.BlockSpec((tm, tn), lambda i, j, k: (i, j)),
        scratch_shapes=[pltpu.VMEM((tm, tn), jnp.float32)],
        compiler_params=pltpu.CompilerParams(
            dimension_semantics=("parallel", "parallel", "arbitrary"),
            vmem_limit_bytes=_VMEM_LIMIT),
        cost_estimate=cost,
    )(*args)
    return out[:M, :cout]


# -------------------- BasicConv wrappers ---------------------------------------

def _im2col(x, k, stride):
    # x: (N, H, W, C) -> patches (N*Ho*Wo, k*k*C), row order (n, ho, wo)
    pad = k // 2
    xp = jnp.pad(x, ((0, 0), (pad, pad), (pad, pad), (0, 0)))
    N, H, W, C = xp.shape
    Ho = (H - k) // stride + 1
    Wo = (W - k) // stride + 1
    cols = []
    for i in range(k):
        for j in range(k):
            cols.append(xp[:, i:i + Ho * stride:stride, j:j + Wo * stride:stride, :])
    p = jnp.stack(cols, axis=3)                       # (N, Ho, Wo, k*k, C)
    return p.reshape(N * Ho * Wo, k * k * C), (N, Ho, Wo)


def conv_bn_mish(x, params, residual=None):
    """x: NHWC f32.  params['w'] is PyTorch-layout (Cout, Cin, k, k)."""
    w, k, stride = params["w"], params["k"], params["stride"]
    cout, cin = w.shape[0], w.shape[1]

    if k == 1 and stride == 1:
        N, H, W, _ = x.shape
        Ho, Wo = H, W
        p = x.reshape(N * H * W, cin)                 # no im2col for 1x1
    else:
        p, (N, Ho, Wo) = _im2col(x, k, stride)

    wmat = jnp.transpose(w, (2, 3, 1, 0)).reshape(k * k * cin, cout)
    r = None if residual is None else residual.reshape(N * Ho * Wo, cout)
    out = _fused_matmul([p], [wmat], params["scale"], params["bias"], residual=r)
    return out.reshape(N, Ho, Wo, cout)


def concat_conv_bn_mish(x1, x0, params):
    """1x1 BasicConv on channel-concat([x1, x0]) without materializing the concat."""
    w = params["w"]                                   # (cout, 2*c2, 1, 1)
    cout = w.shape[0]
    c2 = x1.shape[-1]
    N, H, W, _ = x1.shape
    p1 = x1.reshape(N * H * W, c2)
    p0 = x0.reshape(N * H * W, x0.shape[-1])
    wmat = jnp.transpose(w, (2, 3, 1, 0)).reshape(w.shape[1], cout)  # (2*c2, cout)
    out = _fused_matmul([p1, p0], [wmat[:c2], wmat[c2:]],
                        params["scale"], params["bias"])
    return out.reshape(N, H, W, cout)


# -------------------- parameter construction (deterministic, synthetic) --------

def _init_basicconv(key, cin, cout, k, stride=1):
    k1, k2, k3, k4, k5 = jax.random.split(key, 5)
    w = 0.1 * jax.random.normal(k1, (cout, cin, k, k), jnp.float32)
    gamma = jax.random.uniform(k2, (cout,), jnp.float32, 0.5, 1.5)
    beta = 0.1 * jax.random.normal(k3, (cout,), jnp.float32)
    mean = 0.1 * jax.random.normal(k4, (cout,), jnp.float32)
    var = jax.random.uniform(k5, (cout,), jnp.float32, 0.5, 1.5)
    eps = 1e-5
    scale = gamma / jnp.sqrt(var + eps)               # fold eval-mode BN
    bias = beta - mean * scale
    return dict(w=w, scale=scale, bias=bias, k=k, stride=stride)


def init_resblock_body(key, in_channels, out_channels, num_blocks):
    # first=False branch of Resblocak_body.__init__
    c2 = out_channels // 2
    keys = jax.random.split(key, 5 + 2 * num_blocks)
    return {
        "downsample": _init_basicconv(keys[0], in_channels, out_channels, 3, stride=2),
        "split0": _init_basicconv(keys[1], out_channels, c2, 1),
        "split1": _init_basicconv(keys[2], out_channels, c2, 1),
        "resblocks": [
            {
                "conv1": _init_basicconv(keys[4 + 2 * b], c2, c2, 1),      # 1x1
                "conv2": _init_basicconv(keys[4 + 2 * b + 1], c2, c2, 3),  # 3x3
            }
            for b in range(num_blocks)
        ],
        "block_tail": _init_basicconv(keys[3], c2, c2, 1),
        "concat": _init_basicconv(keys[4 + 2 * num_blocks], out_channels, out_channels, 1),
    }


# -------------------- forward (mirrors Resblocak_body.forward) -----------------

def resblock_body_forward(x_nchw, params):
    x = jnp.transpose(x_nchw, (0, 2, 3, 1))                  # NCHW -> NHWC
    x = conv_bn_mish(x, params["downsample"])                # downsample_conv

    # split_conv0 + split_conv1 fused into one matmul over the shared input
    s0, s1 = params["split0"], params["split1"]
    c2 = s0["w"].shape[0]
    fused_split = dict(
        w=jnp.concatenate([s0["w"], s1["w"]], axis=0),
        scale=jnp.concatenate([s0["scale"], s1["scale"]]),
        bias=jnp.concatenate([s0["bias"], s1["bias"]]),
        k=1, stride=1)
    x01 = conv_bn_mish(x, fused_split)
    x0, x1 = x01[..., :c2], x01[..., c2:]

    for rb in params["resblocks"]:                           # block_conv: Resblocks
        h = conv_bn_mish(x1, rb["conv1"])
        x1 = conv_bn_mish(h, rb["conv2"], residual=x1)       # x + block(x), fused
    x1 = conv_bn_mish(x1, params["block_tail"])              # trailing 1x1 BasicConv

    out = concat_conv_bn_mish(x1, x0, params["concat"])      # cat([x1,x0]) + conv fused
    return jnp.transpose(out, (0, 3, 1, 2))                  # NHWC -> NCHW


if __name__ == "__main__":
    key = jax.random.PRNGKey(0)
    in_channels, out_channels, num_blocks = 4, 8, 2
    params = init_resblock_body(key, in_channels, out_channels, num_blocks)

    x = jax.random.normal(jax.random.fold_in(key, 123),
                          (2, in_channels, 16, 16), jnp.float32)   # NCHW, like PyTorch
    out = resblock_body_forward(x, params)
    jax.block_until_ready(out)
    assert out.shape == (2, out_channels, 8, 8), out.shape
    assert bool(jnp.all(jnp.isfinite(out)))
    print("KERNEL_OK")
</pallas_src>

<mosaic_0001>
module attributes {stable_mosaic.version = 11 : i64} {
  func.func @kernel(%arg0: i32, %arg1: i32, %arg2: i32, %arg3: memref<128x128xbf16, #tpu.memory_space<vmem>>, %arg4: memref<128x128xbf16, #tpu.memory_space<vmem>>, %arg5: memref<1x128xf32, #tpu.memory_space<vmem>>, %arg6: memref<1x128xf32, #tpu.memory_space<vmem>>, %arg7: memref<128x128xf32, #tpu.memory_space<vmem>>, %arg8: memref<128x128xf32, #tpu.memory_space<vmem>>) attributes {dimension_semantics = [#tpu.dimension_semantics<parallel>, #tpu.dimension_semantics<parallel>, #tpu.dimension_semantics<arbitrary>], iteration_bounds = array<i64: 1, 1, 1>, scalar_prefetch = 0 : i64, scratch_operands = 1 : i64, tpu.core_type = #tpu.core_type<tc>, window_params = [{transform_indices = @transform_0, window_bounds = array<i64: 128, 128>}, {transform_indices = @transform_1, window_bounds = array<i64: 128, 128>}, {transform_indices = @transform_2, window_bounds = array<i64: 1, 128>}, {transform_indices = @transform_3, window_bounds = array<i64: 1, 128>}, {transform_indices = @transform_4, window_bounds = array<i64: 128, 128>}]} {
    %c0_i32 = arith.constant 0 : i32
    %0 = arith.cmpi eq, %arg2, %c0_i32 : i32
    %1 = arith.extui %0 : i1 to i32
    %c0_i32_0 = arith.constant 0 : i32
    %2 = arith.cmpi ne, %1, %c0_i32_0 : i32
    scf.if %2 {
      %cst_11 = arith.constant 0.000000e+00 : f32
      %14 = vector.broadcast %cst_11 : f32 to vector<128x128xf32>
      %c0_12 = arith.constant 0 : index
      %c0_13 = arith.constant 0 : index
      %15 = vector.load %arg8[%c0_12, %c0_13] : memref<128x128xf32, #tpu.memory_space<vmem>>, vector<128x128xf32>
      tpu.vector_store %arg8[%c0_12, %c0_13], %14 {strides = array<i32>} : memref<128x128xf32, #tpu.memory_space<vmem>>, vector<128x128xf32>,
    } else {
    }
    %cst = arith.constant 0.000000e+00 : f32
    %3 = vector.broadcast %cst : f32 to vector<128x128xf32>
    %c0 = arith.constant 0 : index
    %c0_1 = arith.constant 0 : index
    %4 = vector.load %arg3[%c0, %c0_1] : memref<128x128xbf16, #tpu.memory_space<vmem>>, vector<128x128xbf16>
    %c0_2 = arith.constant 0 : index
    %c0_3 = arith.constant 0 : index
    %5 = vector.load %arg4[%c0_2, %c0_3] : memref<128x128xbf16, #tpu.memory_space<vmem>>, vector<128x128xbf16>
    %cst_4 = arith.constant dense<0.000000e+00> : vector<128x128xf32>
    %6 = tpu.matmul %4, %5, %cst_4 {dimension_numbers = #tpu.dot_dimension_numbers<[1], [0], [0], [1], [0, 0, 1, 1], [], []>} : vector<128x128xbf16>, vector<128x128xbf16>, vector<128x128xf32> -> vector<128x128xf32>
    %7 = arith.addf %3, %6 : vector<128x128xf32>
    %c0_5 = arith.constant 0 : index
    %c0_6 = arith.constant 0 : index
    %8 = vector.load %arg8[%c0_5, %c0_6] : memref<128x128xf32, #tpu.memory_space<vmem>>, vector<128x128xf32>
    %9 = arith.addf %8, %7 : vector<128x128xf32>
    %c0_7 = arith.constant 0 : index
    %c0_8 = arith.constant 0 : index
    %10 = vector.load %arg8[%c0_7, %c0_8] : memref<128x128xf32, #tpu.memory_space<vmem>>, vector<128x128xf32>
    tpu.vector_store %arg8[%c0_7, %c0_8], %9 {strides = array<i32>} : memref<128x128xf32, #tpu.memory_space<vmem>>, vector<128x128xf32>,
    %c0_i32_9 = arith.constant 0 : i32
    %11 = arith.cmpi eq, %arg2, %c0_i32_9 : i32
    %12 = arith.extui %11 : i1 to i32
    %c0_i32_10 = arith.constant 0 : i32
    %13 = arith.cmpi ne, %12, %c0_i32_10 : i32
    scf.if %13 {
      %c0_11 = arith.constant 0 : index
      %c0_12 = arith.constant 0 : index
      %14 = vector.load %arg8[%c0_11, %c0_12] : memref<128x128xf32, #tpu.memory_space<vmem>>, vector<128x128xf32>
      %c0_13 = arith.constant 0 : index
      %c0_14 = arith.constant 0 : index
      %15 = vector.load %arg5[%c0_13, %c0_14] : memref<1x128xf32, #tpu.memory_space<vmem>>, vector<1x128xf32>
      %16 = vector.broadcast %15 : vector<1x128xf32> to vector<128x128xf32>
      %17 = arith.mulf %14, %16 : vector<128x128xf32>
      %c0_15 = arith.constant 0 : index
      %c0_16 = arith.constant 0 : index
      %18 = vector.load %arg6[%c0_15, %c0_16] : memref<1x128xf32, #tpu.memory_space<vmem>>, vector<1x128xf32>
      %19 = vector.broadcast %18 : vector<1x128xf32> to vector<128x128xf32>
      %20 = arith.addf %17, %19 : vector<128x128xf32>
      %cst_17 = arith.constant 2.000000e+01 : f32
      %21 = vector.broadcast %cst_17 : f32 to vector<128x128xf32>
      %22 = arith.minimumf %20, %21 : vector<128x128xf32>
      %23 = math.exp %22 : vector<128x128xf32>
      %cst_18 = arith.constant 2.000000e+00 : f32
      %24 = vector.broadcast %cst_18 : f32 to vector<128x128xf32>
      %25 = arith.addf %23, %24 : vector<128x128xf32>
      %26 = arith.mulf %23, %25 : vector<128x128xf32>
      %27 = arith.mulf %20, %26 : vector<128x128xf32>
      %cst_19 = arith.constant 2.000000e+00 : f32
      %28 = vector.broadcast %cst_19 : f32 to vector<128x128xf32>
      %29 = arith.addf %26, %28 : vector<128x128xf32>
      %30 = tpu.reciprocal %29 {approx = true} : vector<128x128xf32> -> vector<128x128xf32>
      %31 = arith.mulf %27, %30 : vector<128x128xf32>
      %cst_20 = arith.constant 2.000000e+01 : f32
      %32 = vector.broadcast %cst_20 : f32 to vector<128x128xf32>
      %33 = arith.cmpf ogt, %20, %32 : vector<128x128xf32>
      %34 = arith.select %33, %20, %31 : vector<128x128xi1>, vector<128x128xf32>
      %c0_21 = arith.constant 0 : index
      %c0_22 = arith.constant 0 : index
      %35 = vector.load %arg7[%c0_21, %c0_22] : memref<128x128xf32, #tpu.memory_space<vmem>>, vector<128x128xf32>
      tpu.vector_store %arg7[%c0_21, %c0_22], %34 {strides = array<i32>} : memref<128x128xf32, #tpu.memory_space<vmem>>, vector<128x128xf32>,
    } else {
    }
    return
  }
  func.func @transform_0(%arg0: i32, %arg1: i32, %arg2: i32) -> (i32, i32) {
    %c0_i32 = arith.constant 0 : i32
    return %arg0, %arg2 : i32, i32
  }
  func.func @transform_1(%arg0: i32, %arg1: i32, %arg2: i32) -> (i32, i32) {
    %c0_i32 = arith.constant 0 : i32
    return %arg2, %arg1 : i32, i32
  }
  func.func @transform_2(%arg0: i32, %arg1: i32, %arg2: i32) -> (i32, i32) {
    %c0_i32 = arith.constant 0 : i32
    %c0_i32_0 = arith.constant 0 : i32
    return %c0_i32, %arg1 : i32, i32
  }
  func.func @transform_3(%arg0: i32, %arg1: i32, %arg2: i32) -> (i32, i32) {
    %c0_i32 = arith.constant 0 : i32
    %c0_i32_0 = arith.constant 0 : i32
    return %c0_i32, %arg1 : i32, i32
  }
  func.func @transform_4(%arg0: i32, %arg1: i32, %arg2: i32) -> (i32, i32) {
    %c0_i32 = arith.constant 0 : i32
    return %arg0, %arg1 : i32, i32
  }
}

</mosaic_0001>

<bundles_post_ra>
// kernel: tpu_custom_call.1
= control target key start
LH: loop header
LB: loop body
LE: loop exit
PB: predicated region body
PF: predicated region fallthrough
CT: control target
= control target key end

     0   :  { %9 = vsyncpa [#allocation4], 0  ;;  %s1103_s0 = inlined_call_operand.hbm [shape: bf16[128,128], index: 0, kind: input, shape index: {}]   ;;  %s1104_s1 = inlined_call_operand.hbm [shape: bf16[128,128], index: 1, kind: input, shape index: {}]   ;;  %s1105_s2 = inlined_call_operand.vmem [shape: f32[1,128], index: 2, kind: input, shape index: {}]   ;;  %s1106_s3 = inlined_call_operand.vmem [shape: f32[1,128], index: 3, kind: input, shape index: {}]   ;;  %s1107_s4 = inlined_call_operand.hbm [shape: f32[128,128], index: 4, kind: output, shape index: {}]  }
   0x1   :  { %10 = vsyncpa [#allocation7], 0 }
   0x2   :  { %11 = vsyncpa [#allocation5], 0  ;;  %s856_s15 = smov [#allocation3]   ;;  %s784_s19 = scalar_lea.hbm %s1103_s0, 1024 }
   0x3   :  { %s17_s16 = sshll.u32 %s856_s15, 4  ;;  %p785_p0 = scmp.ne.s32.totalorder %s1103_s0, %s784_s19  ;;  %s18_s16 = int_to_ptr.vmem [resolvable:$true] %s17_s16 }
   0x4   :  { %p788_p1 = scmp.lt.u32.totalorder %s784_s19, %s1103_s0 }
   0x6   :  { %p790_p2 = pnand %p788_p1, %p785_p0 }
   0x8   :  { %793 = shalt.err (!%p790_p2)
}
   0x9   :  { %s794_s24 = scalar_lea.vmem %s18_s16, 1024  ;;  %p799_p4 = scmp.lt.s32.totalorder %s18_s16, %s18_s16 }
   0xa   :  { %p795_p3 = scmp.ne.s32.totalorder %s18_s16, %s794_s24  ;;  %p800_p5 = scmp.lt.s32.totalorder %s794_s24, %s794_s24 }
   0xc   :  { %p801_p6 = por %p800_p5, %p799_p4 }
   0xe   :  { %p802_p7 = pnand %p801_p6, %p795_p3 }
  0x10   :  { %805 = shalt.err (!%p802_p7)
}
  0x11   :  { %s857_s25 = smov 64   ;;  %s858_s26 = smov 4  }
  0x12   :  { %23 = dma.hbm_to_vmem [thread:$0]  %s1103_s0, 1024, %s18_s16, [#allocation4], %s857_s25, %s857_s25, %s858_s26  }
  0x13   :  { %s859_s29 = smov [#allocation6]   ;;  %s806_s7 = scalar_lea.hbm %s1104_s1, 1024 }
  0x14   :  { %s29_s30 = sshll.u32 %s859_s29, 4  ;;  %p807_p8 = scmp.ne.s32.totalorder %s1104_s1, %s806_s7  ;;  %s30_s30 = int_to_ptr.vmem [resolvable:$true] %s29_s30 }
  0x15   :  { %p810_p9 = scmp.lt.u32.totalorder %s806_s7, %s1104_s1 }
  0x17   :  { %p812_p10 = pnand %p810_p9, %p807_p8 }
  0x19   :  { %815 = shalt.err (!%p812_p10)
}
  0x1a   :  { %s816_s12 = scalar_lea.vmem %s30_s30, 1024  ;;  %p821_p12 = scmp.lt.s32.totalorder %s30_s30, %s30_s30 }
  0x1b   :  { %p817_p11 = scmp.ne.s32.totalorder %s30_s30, %s816_s12  ;;  %p822_p13 = scmp.lt.s32.totalorder %s816_s12, %s816_s12 }
  0x1d   :  { %p823_p0 = por %p822_p13, %p821_p12 }
  0x1f   :  { %p824_p1 = pnand %p823_p0, %p817_p11 }
  0x21   :  { %827 = shalt.err (!%p824_p1)
}
  0x22   :  { %35 = dma.hbm_to_vmem [thread:$0]  %s1104_s1, 1024, %s30_s30, [#allocation7], %s857_s25, %s857_s25, %s858_s26  }
  0x23   :  { %850 = dma.done.wait [#allocation4], 1024  }
  0x24   :  { %851 = vsyncadd [#allocation4], 4294966272 }
  0x25   :  { %852 = dma.done.wait [#allocation7], 1024  }
  0x26   :  { %853 = vsyncadd [#allocation7], 4294966272  ;;  %v704_v0 = vld [vmem:[#allocation6] sm:$0xff]   ;;  %v705_v1 = vld [vmem:[#allocation6 + $0x8] sm:$0xff]  }
  0x27   :  { %649 = vmatprep.subr.bf16.mxu0 %v704_v0  ;;  %681 = vmatprep.subr.bf16.mxu1 %v704_v0  ;;  %v706_v2 = vld [vmem:[#allocation6 + $0x10] sm:$0xff]   ;;  %v707_v3 = vld [vmem:[#allocation6 + $0x18] sm:$0xff]   ;;  %v712_v4 = vld [vmem:[#allocation3] sm:$0xff]  }
  0x28   :  { %650 = vmatpush3.bf16.msra.mxu0 %v704_v0  ;;  %689 = vmatpush3.bf16.msra.mxu1 %v704_v0  ;;  %v713_v5 = vld [vmem:[#allocation3 + $0x20] sm:$0xff]   ;;  %v709_v7 = vld [vmem:[#allocation6 + $0x28] sm:$0xff]   ;;  %v710_v8 = vld [vmem:[#allocation6 + $0x30] sm:$0xff]  }
  0x29   :  { %651 = vmatprep.subr.bf16.mxu0 %v705_v1  ;;  %682 = vmatprep.subr.bf16.mxu1 %v705_v1  ;;  %v708_v6 = vld [vmem:[#allocation6 + $0x20] sm:$0xff]   ;;  %v711_v9 = vld [vmem:[#allocation6 + $0x38] sm:$0xff]   ;;  %v714_v10 = vld [vmem:[#allocation3 + $0x8] sm:$0xff]  }
  0x2a   :  { %665 = vmatprep.mubr.bf16.mxu0 %v712_v4  ;;  %673 = vmatprep.mubr.bf16.mxu1 %v713_v5  ;;  %v715_v11 = vld [vmem:[#allocation3 + $0x28] sm:$0xff]   ;;  %v716_v12 = vld [vmem:[#allocation3 + $0x10] sm:$0xff]   ;;  %v718_v14 = vld [vmem:[#allocation3 + $0x18] sm:$0xff]  }
  0x2b   :  { %v717_v13 = vld [vmem:[#allocation3 + $0x30] sm:$0xff]   ;;  %v719_v15 = vld [vmem:[#allocation3 + $0x38] sm:$0xff]   ;;  %v915_v16 = vld [vmem:[%s1105_s2] ss:$0 sm:$0xff]  ;;  %s860_s2 = smov [#allocation8]  }
  0x2c   :  { %652 = vmatpush3.bf16.msra.mxu0 %v705_v1  ;;  %690 = vmatpush3.bf16.msra.mxu1 %v705_v1  ;;  %v920_v18 = vld [vmem:[%s1106_s3] ss:$0 sm:$0xff]  ;;  %s602_s3 = sshll.u32 %s860_s2, 4  ;;  %s603_s3 = int_to_ptr.vmem [resolvable:$true] %s602_s3 }
  0x2d   :  { %653 = vmatprep.subr.bf16.mxu0 %v706_v2  ;;  %683 = vmatprep.subr.bf16.mxu1 %v706_v2  ;;  %s828_s17 = scalar_lea.vmem %s603_s3, 2048  ;;  %p833_p3 = scmp.lt.s32.totalorder %s603_s3, %s603_s3 }
  0x2e   :  { %p829_p2 = scmp.ne.s32.totalorder %s603_s3, %s828_s17  ;;  %p834_p4 = scmp.lt.s32.totalorder %s828_s17, %s828_s17 }
  0x30   :  { %654 = vmatpush3.bf16.msra.mxu0 %v706_v2  ;;  %691 = vmatpush3.bf16.msra.mxu1 %v706_v2  ;;  %p835_p5 = por %p834_p4, %p833_p3 }
  0x31   :  { %655 = vmatprep.subr.bf16.mxu0 %v707_v3  ;;  %684 = vmatprep.subr.bf16.mxu1 %v707_v3 }
  0x32   :  { %p836_p6 = pnand %p835_p5, %p829_p2 }
  0x34   :  { %656 = vmatpush3.bf16.msra.mxu0 %v707_v3  ;;  %692 = vmatpush3.bf16.msra.mxu1 %v707_v3 }
  0x35   :  { %657 = vmatprep.subr.bf16.mxu0 %v708_v6  ;;  %685 = vmatprep.subr.bf16.mxu1 %v708_v6 }
  0x38   :  { %658 = vmatpush3.bf16.msra.mxu0 %v708_v6  ;;  %693 = vmatpush3.bf16.msra.mxu1 %v708_v6 }
  0x39   :  { %659 = vmatprep.subr.bf16.mxu0 %v709_v7  ;;  %686 = vmatprep.subr.bf16.mxu1 %v709_v7 }
  0x3c   :  { %660 = vmatpush3.bf16.msra.mxu0 %v709_v7  ;;  %694 = vmatpush3.bf16.msra.mxu1 %v709_v7 }
  0x3d   :  { %661 = vmatprep.subr.bf16.mxu0 %v710_v8  ;;  %687 = vmatprep.subr.bf16.mxu1 %v710_v8 }
  0x40   :  { %662 = vmatpush3.bf16.msra.mxu0 %v710_v8  ;;  %695 = vmatpush3.bf16.msra.mxu1 %v710_v8 }
  0x41   :  { %663 = vmatprep.subr.bf16.mxu0 %v711_v9  ;;  %688 = vmatprep.subr.bf16.mxu1 %v711_v9 }
  0x44   :  { %664 = vmatpush3.bf16.msra.mxu0 %v711_v9  ;;  %696 = vmatpush3.bf16.msra.mxu1 %v711_v9 }
  0x47   :  { %666 = vmatmul.mubr.bf16.vlgmr.msra.gmra.mrb[0].mxu0 %v714_v10  ;;  %674 = vmatmul.mubr.bf16.vlgmr.msra.gmra.mrb[0].mxu1 %v715_v11 }
  0x48   :  { %669 = vmatprep.mubr.bf16.mxu0 %v716_v12  ;;  %677 = vmatprep.mubr.bf16.mxu1 %v717_v13 }
  0x4f   :  { %670 = vmatmul.mubr.bf16.gmra.mrb[4].mxu0 %v718_v14  ;;  %678 = vmatmul.mubr.bf16.gmra.mrb[4].mxu1 %v719_v15 }
 0x11a   :  { %v667_v17 = vpop.f32.mrb[0].mxu0  ;;  %v675_v19 = vpop.f32.mrb[0].mxu1 }
 0x11b   :  { %v368_v20 = vmul.f32 %v667_v17, %v915_v16  ;;  %v376_v21 = vmul.f32 %v675_v19, %v915_v16  ;;  %v229_v22 = vpop.f32.mrb[1].mxu0  ;;  %v261_v23 = vpop.f32.mrb[1].mxu1 }
 0x11c   :  { %v366_v24 = vmul.f32 %v915_v16, %v229_v22  ;;  %v374_v25 = vmul.f32 %v915_v16, %v261_v23  ;;  %v668_v26 = vpop.f32.mrb[2].mxu0  ;;  %v676_v27 = vpop.f32.mrb[2].mxu1 }
 0x11d   :  { %v927_v28 = vadd.f32 %v920_v18, %v368_v20  ;;  %v930_v29 = vadd.f32 %v920_v18, %v376_v21  ;;  %v369_v30 = vmul.f32 %v668_v26, %v915_v16  ;;  %v377_v31 = vmul.f32 %v676_v27, %v915_v16  ;;  %v232_v32 = vpop.f32.mrb[3].mxu0  ;;  %v264_v33 = vpop.f32.mrb[3].mxu1 }
 0x11e   :  { %v935_v34 = vadd.f32 %v920_v18, %v366_v24  ;;  %v938_v35 = vadd.f32 %v920_v18, %v374_v25  ;;  %v367_v36 = vmul.f32 %v915_v16, %v232_v32  ;;  %v375_v37 = vmul.f32 %v915_v16, %v264_v33 }
 0x11f   :  { %v407_v38 = vmin.f32 %v927_v28, 20.0  ;;  %v415_v39 = vmin.f32 %v930_v29, 20.0  ;;  %v947_v44 = vadd.f32 %v920_v18, %v369_v30  ;;  %v950_v45 = vadd.f32 %v920_v18, %v377_v31 }
 0x120   :  { %v405_v40 = vmin.f32 %v935_v34, 20.0  ;;  %v413_v41 = vmin.f32 %v938_v35, 20.0  ;;  %v953_v48 = vadd.f32 %v920_v18, %v367_v36  ;;  %v956_v49 = vadd.f32 %v920_v18, %v375_v37 }
 0x121   :  { %v425_v42 = vmul.f32 1.442695, %v407_v38  ;;  %v441_v43 = vmul.f32 1.442695, %v415_v39  ;;  %v408_v52 = vmin.f32 %v947_v44, 20.0  ;;  %v416_v53 = vmin.f32 %v950_v45, 20.0 }
 0x122   :  { %v421_v46 = vmul.f32 1.442695, %v405_v40  ;;  %v437_v47 = vmul.f32 1.442695, %v413_v41  ;;  %v671_v50 = vpop.f32.mrb[4].mxu0  ;;  %v679_v51 = vpop.f32.mrb[4].mxu1 }
 0x123   :  { %720 = vpow2.f32 %v425_v42  ;;  %v245_v54 = vpop.f32.mrb[5].mxu0  ;;  %v277_v55 = vpop.f32.mrb[5].mxu1  ;;  %v406_v56 = vmin.f32 %v953_v48, 20.0  ;;  %v427_v59 = vmul.f32 1.442695, %v408_v52  ;;  %v414_v61 = vmin.f32 %v956_v49, 20.0 }
 0x124   :  { %722 = vpow2.f32 %v441_v43  ;;  %v672_v57 = vpop.f32.mrb[6].mxu0  ;;  %v680_v58 = vpop.f32.mrb[6].mxu1  ;;  %v443_v60 = vmul.f32 1.442695, %v416_v53  ;;  %v372_v0 = vmul.f32 %v671_v50, %v915_v16  ;;  %v380_v3 = vmul.f32 %v679_v51, %v915_v16 }
 0x125   :  { %724 = vpow2.f32 %v421_v46  ;;  %v248_v62 = vpop.f32.mrb[7].mxu0  ;;  %v423_v63 = vmul.f32 1.442695, %v406_v56  ;;  %v963_v1 = vpop.f32.mrb[7].mxu1  ;;  %v439_v2 = vmul.f32 1.442695, %v414_v61  ;;  %v370_v4 = vmul.f32 %v915_v16, %v245_v54 }
 0x126   :  { %726 = vpow2.f32 %v437_v47  ;;  %v968_v5 = vadd.f32 %v920_v18, %v372_v0  ;;  %v378_v6 = vmul.f32 %v915_v16, %v277_v55  ;;  %v972_v7 = vadd.f32 %v920_v18, %v380_v3 }
 0x127   :  { %728 = vpow2.f32 %v427_v59  ;;  %v975_v8 = vadd.f32 %v920_v18, %v370_v4  ;;  %v373_v11 = vmul.f32 %v672_v57, %v915_v16  ;;  %v381_v17 = vmul.f32 %v680_v58, %v915_v16 }
 0x128   :  { %730 = vpow2.f32 %v443_v60  ;;  %v411_v9 = vmin.f32 %v968_v5, 20.0  ;;  %v979_v10 = vadd.f32 %v920_v18, %v378_v6  ;;  %v419_v12 = vmin.f32 %v972_v7, 20.0 }
 0x129   :  { %732 = vpow2.f32 %v423_v63  ;;  %v409_v13 = vmin.f32 %v975_v8, 20.0  ;;  %v987_v25 = vadd.f32 %v920_v18, %v373_v11  ;;  %v990_v33 = vadd.f32 %v920_v18, %v381_v17 }
 0x12a   :  { %734 = vpow2.f32 %v439_v2  ;;  %v433_v14 = vmul.f32 1.442695, %v411_v9  ;;  %v417_v15 = vmin.f32 %v979_v10, 20.0  ;;  %v449_v20 = vmul.f32 1.442695, %v419_v12 }
 0x12b   :  { %v429_v21 = vmul.f32 1.442695, %v409_v13  ;;  %v412_v43 = vmin.f32 %v987_v25, 20.0  ;;  %v420_v55 = vmin.f32 %v990_v33, 20.0  ;;  %v371_v58 = vmul.f32 %v915_v16, %v248_v62 }
 0x12c   :  { %736 = vpow2.f32 %v433_v14  ;;  %v445_v24 = vmul.f32 1.442695, %v417_v15  ;;  %vm551_vm0 = vcmp.gt.f32.partialorder %v927_v28, 20.0  ;;  %vm559_vm1 = vcmp.gt.f32.partialorder %v930_v29, 20.0 }
 0x12d   :  { %v721_v19 = vpop.eup %720  ;;  %738 = vpow2.f32 %v449_v20  ;;  %v435_v61 = vmul.f32 1.442695, %v412_v43  ;;  %v451_v4 = vmul.f32 1.442695, %v420_v55  ;;  %v1005_v11 = vadd.f32 %v920_v18, %v371_v58 }
 0x12e   :  { %v723_v22 = vpop.eup %722  ;;  %v455_v23 = vadd.f32 2.0, %v721_v19  ;;  %740 = vpow2.f32 %v429_v21  ;;  %vm549_vm2 = vcmp.gt.f32.partialorder %v935_v34, 20.0  ;;  %vm557_vm3 = vcmp.gt.f32.partialorder %v938_v35, 20.0 }
 0x12f   :  { %v725_v26 = vpop.eup %724  ;;  %v463_v27 = vadd.f32 2.0, %v723_v22  ;;  %742 = vpow2.f32 %v445_v24  ;;  %vm552_vm4 = vcmp.gt.f32.partialorder %v947_v44, 20.0  ;;  %vm560_vm5 = vcmp.gt.f32.partialorder %v950_v45, 20.0 }
 0x130   :  { %v727_v30 = vpop.eup %726  ;;  %v471_v31 = vmul.f32 %v721_v19, %v455_v23  ;;  %v453_v32 = vadd.f32 2.0, %v725_v26  ;;  %vm550_vm6 = vcmp.gt.f32.partialorder %v953_v48, 20.0  ;;  %vm558_vm7 = vcmp.gt.f32.partialorder %v956_v49, 20.0 }
 0x131   :  { %v729_v36 = vpop.eup %728  ;;  %v479_v37 = vmul.f32 %v723_v22, %v463_v27  ;;  %v461_v38 = vadd.f32 2.0, %v727_v30  ;;  %vm555_vm8 = vcmp.gt.f32.partialorder %v968_v5, 20.0  ;;  %vm563_vm9 = vcmp.gt.f32.partialorder %v972_v7, 20.0 }
 0x132   :  { %v731_v39 = vpop.eup %730  ;;  %v503_v40 = vadd.f32 2.0, %v471_v31  ;;  %v469_v41 = vmul.f32 %v725_v26, %v453_v32  ;;  %v456_v42 = vadd.f32 2.0, %v729_v36  ;;  %v487_v13 = vmul.f32 %v471_v31, %v927_v28 }
 0x133   :  { %v733_v46 = vpop.eup %732  ;;  %v511_v47 = vadd.f32 2.0, %v479_v37  ;;  %v477_v50 = vmul.f32 %v727_v30, %v461_v38  ;;  %v464_v51 = vadd.f32 2.0, %v731_v39  ;;  %v495_v19 = vmul.f32 %v479_v37, %v930_v29 }
 0x134   :  { %v735_v52 = vpop.eup %734  ;;  %744 = vrcp.f32 %v503_v40  ;;  %v501_v53 = vadd.f32 2.0, %v469_v41  ;;  %v472_v54 = vmul.f32 %v729_v36, %v456_v42  ;;  %v454_v60 = vadd.f32 2.0, %v733_v46 }
 0x135   :  { %746 = vrcp.f32 %v511_v47  ;;  %v509_v56 = vadd.f32 2.0, %v477_v50  ;;  %v994_v57 = vmul.f32 %v731_v39, %v464_v51  ;;  %v462_v0 = vadd.f32 2.0, %v735_v52 }
 0x136   :  { %748 = vrcp.f32 %v501_v53  ;;  %v504_v59 = vadd.f32 2.0, %v472_v54  ;;  %v737_v2 = vpop.eup %736  ;;  %v999_v3 = vmul.f32 %v733_v46, %v454_v60  ;;  %v485_v23 = vmul.f32 %v469_v41, %v935_v34 }
 0x137   :  { %750 = vrcp.f32 %v509_v56  ;;  %v512_v63 = vadd.f32 2.0, %v994_v57  ;;  %v739_v6 = vpop.eup %738  ;;  %v1002_v62 = vmul.f32 %v735_v52, %v462_v0  ;;  %v459_v9 = vadd.f32 2.0, %v737_v2 }
 0x138   :  { %752 = vrcp.f32 %v504_v59  ;;  %v741_v12 = vpop.eup %740  ;;  %v502_v14 = vadd.f32 2.0, %v999_v3  ;;  %v467_v15 = vadd.f32 2.0, %v739_v6  ;;  %v410_v31 = vmin.f32 %v1005_v11, 20.0 }
 0x139   :  { %754 = vrcp.f32 %v512_v63  ;;  %v743_v17 = vpop.eup %742  ;;  %v510_v20 = vadd.f32 2.0, %v1002_v62  ;;  %v1013_v21 = vmul.f32 %v737_v2, %v459_v9  ;;  %v457_v22 = vadd.f32 2.0, %v741_v12 }
 0x13a   :  { %756 = vpow2.f32 %v435_v61  ;;  %v1016_v24 = vmul.f32 %v739_v6, %v467_v15  ;;  %v465_v26 = vadd.f32 2.0, %v743_v17  ;;  %v493_v36 = vmul.f32 %v477_v50, %v938_v35 }
 0x13b   :  { %758 = vrcp.f32 %v502_v14  ;;  %v507_v27 = vadd.f32 2.0, %v1013_v21  ;;  %v1019_v30 = vmul.f32 %v741_v12, %v457_v22  ;;  %v379_v42 = vmul.f32 %v915_v16, %v963_v1 }
 0x13c   :  { %760 = vrcp.f32 %v510_v20  ;;  %v515_v37 = vadd.f32 2.0, %v1016_v24  ;;  %v1024_v38 = vmul.f32 %v743_v17, %v465_v26  ;;  %v488_v47 = vmul.f32 %v472_v54, %v947_v44 }
 0x13d   :  { %762 = vpow2.f32 %v451_v4  ;;  %v505_v41 = vadd.f32 2.0, %v1019_v30  ;;  %v431_v55 = vmul.f32 1.442695, %v410_v31  ;;  %v496_v54 = vmul.f32 %v994_v57, %v950_v45 }
 0x13e   :  { %v745_v32 = vpop.eup %744  ;;  %764 = vrcp.f32 %v507_v27  ;;  %v513_v50 = vadd.f32 2.0, %v1024_v38  ;;  %v1043_v60 = vadd.f32 %v920_v18, %v379_v42  ;;  %v489_v26 = vmul.f32 %v1019_v30, %v975_v8 }
 0x13f   :  { %v747_v39 = vpop.eup %746  ;;  %v535_v40 = vmul.f32 %v745_v32, %v487_v13  ;;  %766 = vrcp.f32 %v515_v37  ;;  %vm553_vm10 = vcmp.gt.f32.partialorder %v975_v8, 20.0  ;;  %vm561_vm11 = vcmp.gt.f32.partialorder %v979_v10, 20.0 }
 0x140   :  { %v749_v43 = vpop.eup %748  ;;  %v543_v46 = vmul.f32 %v747_v39, %v495_v19  ;;  %768 = vrcp.f32 %v505_v41  ;;  %v418_v18 = vmin.f32 %v1043_v60, 20.0  ;;  %vm556_vm12 = vcmp.gt.f32.partialorder %v987_v25, 20.0 }
 0x141   :  { %v751_v51 = vpop.eup %750  ;;  %v567_v52 = vsel %vm551_vm0, %v927_v28, %v535_v40  ;;  %v533_v53 = vmul.f32 %v749_v43, %v485_v23  ;;  %770 = vrcp.f32 %v513_v50  ;;  %vm564_vm13 = vcmp.gt.f32.partialorder %v990_v33, 20.0 }
 0x142   :  { %v753_v56 = vpop.eup %752  ;;  %583 = vst [vmem:[#allocation8 + $0x10] sm:$0xff] %v567_v52  ;;  %v575_v16 = vsel %vm559_vm1, %v930_v29, %v543_v46  ;;  %v541_v1 = vmul.f32 %v751_v51, %v493_v36  ;;  %772 = vpow2.f32 %v431_v55  ;;  %vm554_vm14 = vcmp.gt.f32.partialorder %v1005_v11, 20.0 }
 0x143   :  { %v755_v58 = vpop.eup %754  ;;  %591 = vst [vmem:[#allocation8 + $0x50] sm:$0xff] %v575_v16  ;;  %v565_v28 = vsel %vm549_vm2, %v935_v34, %v533_v53  ;;  %v536_v59 = vmul.f32 %v753_v56, %v488_v47  ;;  %v486_v34 = vmul.f32 %v999_v3, %v953_v48  ;;  %v491_v3 = vmul.f32 %v1013_v21, %v968_v5 }
 0x144   :  { %v757_v61 = vpop.eup %756  ;;  %581 = vst [vmem:[#allocation8] sm:$0xff] %v565_v28  ;;  %v573_v29 = vsel %vm557_vm3, %v938_v35, %v541_v1  ;;  %v544_v57 = vmul.f32 %v755_v58, %v496_v54  ;;  %v494_v35 = vmul.f32 %v1002_v62, %v956_v49  ;;  %v499_v62 = vmul.f32 %v1016_v24, %v972_v7 }
 0x145   :  { %589 = vst [vmem:[#allocation8 + $0x40] sm:$0xff] %v573_v29  ;;  %v568_v63 = vsel %vm552_vm4, %v947_v44, %v536_v59  ;;  %v460_v0 = vadd.f32 2.0, %v757_v61  ;;  %v759_v2 = vpop.eup %758  ;;  %v447_v44 = vmul.f32 1.442695, %v418_v18  ;;  %vm562_vm15 = vcmp.gt.f32.partialorder %v1043_v60, 20.0 }
 0x146   :  { %584 = vst [vmem:[#allocation8 + $0x18] sm:$0xff] %v568_v63  ;;  %v576_v4 = vsel %vm560_vm5, %v950_v45, %v544_v57  ;;  %v761_v6 = vpop.eup %760  ;;  %v534_v9 = vmul.f32 %v759_v2, %v486_v34 }
 0x147   :  { %592 = vst [vmem:[#allocation8 + $0x58] sm:$0xff] %v576_v4  ;;  %v476_v12 = vmul.f32 %v757_v61, %v460_v0  ;;  %v763_v13 = vpop.eup %762  ;;  %v542_v14 = vmul.f32 %v761_v6, %v494_v35  ;;  %774 = vpow2.f32 %v447_v44 }
 0x148   :  { %v765_v45 = vpop.eup %764  ;;  %v566_v15 = vsel %vm550_vm6, %v953_v48, %v534_v9  ;;  %v468_v19 = vadd.f32 2.0, %v763_v13  ;;  %v497_v48 = vmul.f32 %v1024_v38, %v979_v10 }
 0x149   :  { %v508_v17 = vadd.f32 2.0, %v476_v12  ;;  %v767_v20 = vpop.eup %766  ;;  %582 = vst [vmem:[#allocation8 + $0x8] sm:$0xff] %v566_v15  ;;  %v574_v22 = vsel %vm558_vm7, %v956_v49, %v542_v14  ;;  %v539_v23 = vmul.f32 %v765_v45, %v491_v3 }
 0x14a   :  { %v769_v21 = vpop.eup %768  ;;  %590 = vst [vmem:[#allocation8 + $0x48] sm:$0xff] %v574_v22  ;;  %v547_v27 = vmul.f32 %v767_v20, %v499_v62  ;;  %v484_v31 = vmul.f32 %v763_v13, %v468_v19 }
 0x14b   :  { %776 = vrcp.f32 %v508_v17  ;;  %v771_v24 = vpop.eup %770  ;;  %v571_v32 = vsel %vm555_vm8, %v968_v5, %v539_v23  ;;  %v537_v49 = vmul.f32 %v769_v21, %v489_v26 }
 0x14c   :  { %v773_v36 = vpop.eup %772  ;;  %587 = vst [vmem:[#allocation8 + $0x30] sm:$0xff] %v571_v32  ;;  %v579_v30 = vsel %vm563_vm9, %v972_v7, %v547_v27  ;;  %v545_v37 = vmul.f32 %v771_v24, %v497_v48  ;;  %v516_v39 = vadd.f32 2.0, %v484_v31  ;;  %v492_v7 = vmul.f32 %v476_v12, %v987_v25 }
 0x14d   :  { %595 = vst [vmem:[#allocation8 + $0x70] sm:$0xff] %v579_v30  ;;  %v569_v38 = vsel %vm553_vm10, %v975_v8, %v537_v49  ;;  %v458_v40 = vadd.f32 2.0, %v773_v36  ;;  %v500_v52 = vmul.f32 %v484_v31, %v990_v33 }
 0x14e   :  { %585 = vst [vmem:[#allocation8 + $0x20] sm:$0xff] %v569_v38  ;;  %v577_v5 = vsel %vm561_vm11, %v979_v10, %v545_v37  ;;  %778 = vrcp.f32 %v516_v39 }
 0x14f   :  { %593 = vst [vmem:[#allocation8 + $0x60] sm:$0xff] %v577_v5  ;;  %v474_v41 = vmul.f32 %v773_v36, %v458_v40 }
 0x151   :  { %v506_v42 = vadd.f32 2.0, %v474_v41  ;;  %v775_v43 = vpop.eup %774  ;;  %v490_v16 = vmul.f32 %v474_v41, %v1005_v11 }
 0x152   :  { %v466_v47 = vadd.f32 2.0, %v775_v43 }
 0x153   :  { %780 = vrcp.f32 %v506_v42 }
 0x154   :  { %v482_v8 = vmul.f32 %v775_v43, %v466_v47 }
 0x155   :  { %v777_v46 = vpop.eup %776 }
 0x156   :  { %v540_v50 = vmul.f32 %v777_v46, %v492_v7  ;;  %v514_v10 = vadd.f32 2.0, %v482_v8  ;;  %v498_v58 = vmul.f32 %v482_v8, %v1043_v60 }
 0x158   :  { %v572_v51 = vsel %vm556_vm12, %v987_v25, %v540_v50  ;;  %v779_v53 = vpop.eup %778  ;;  %782 = vrcp.f32 %v514_v10 }
 0x159   :  { %588 = vst [vmem:[#allocation8 + $0x38] sm:$0xff] %v572_v51  ;;  %v548_v55 = vmul.f32 %v779_v53, %v500_v52 }
 0x15b   :  { %v580_v56 = vsel %vm564_vm13, %v990_v33, %v548_v55 }
 0x15c   :  { %596 = vst [vmem:[#allocation8 + $0x78] sm:$0xff] %v580_v56 }
 0x15d   :  { %v781_v1 = vpop.eup %780 }
 0x15e   :  { %v538_v54 = vmul.f32 %v781_v1, %v490_v16 }
 0x160   :  { %v570_v25 = vsel %vm554_vm14, %v1005_v11, %v538_v54 }
 0x161   :  { %586 = vst [vmem:[#allocation8 + $0x28] sm:$0xff] %v570_v25 }
 0x162   :  { %v783_v28 = vpop.eup %782 }
 0x163   :  { %v546_v59 = vmul.f32 %v783_v28, %v498_v58 }
 0x165   :  { %v578_v33 = vsel %vm562_vm15, %v1043_v60, %v546_v59 }
 0x166   :  { %594 = vst [vmem:[#allocation8 + $0x68] sm:$0xff] %v578_v33 }
 0x167   :  { %839 = shalt.err (!%p836_p6)
}
 0x168   :  { %s840_s20 = scalar_lea.hbm %s1107_s4, 2048 }
 0x169   :  { %p841_p7 = scmp.ne.s32.totalorder %s1107_s4, %s840_s20  ;;  %p844_p8 = scmp.lt.u32.totalorder %s840_s20, %s1107_s4 }
 0x16b   :  { %p846_p9 = pnand %p844_p8, %p841_p7 }
 0x16d   :  { %849 = shalt.err (!%p846_p9)
}
 0x16e   :  { %s861_s25 = smov 128   ;;  %s862_s26 = smov 8  }
 0x16f   :  { %608 = dma.vmem_to_hbm [thread:$0]  %s603_s3, 2048, %s1107_s4, [#allocation5], %s861_s25, %s861_s25, %s862_s26  }
 0x170   :  { %854 = dma.done.wait [#allocation5], 2048  }
 0x171   :  { %855 = vsyncadd [#allocation5], 4294965248 }
 0x172   :  { %612 = vsyncpa [#allocation4], 1 }
 0x173   :  { %613 = vsyncpa [#allocation7], 1 }
 0x174   :  { %614 = vsyncpa [#allocation5], 1 }

</bundles_post_ra>
